<compile_context>
chip_gen: v5e
topology: v5e:2x2
jax: 0.10.0
libtpu: 0.0.40
codegen_flags: <defaults>
</compile_context>

<pallas_src>
import jax
import jax.numpy as jnp
import numpy as np
from jax.experimental import pallas as pl
from jax.experimental.pallas import tpu as pltpu

H1 = 256          # fc1 width
H2 = 256          # fc2 width
OUT_PAD = 128     # fc3 has 1 output; pad to a full lane width for the store
MAX_ROW_TILE = 256


def _round_up(x, m):
    return ((x + m - 1) // m) * m


# ----------------------------- Pallas kernel ------------------------------ #

def _vector_q_kernel(x_ref, a_ref, w1x_ref, w1a_ref, b1_ref,
                     w2_ref, b2_ref, w3_ref, b3_ref, o_ref):
    """Fused  relu(relu([x,a]@W1 + b1)@W2 + b2)@W3 + b3  on one row tile."""
    # fc1: concat folded into two accumulated matmuls.
    h = jnp.dot(x_ref[...], w1x_ref[...], preferred_element_type=jnp.float32)
    h = h + jnp.dot(a_ref[...], w1a_ref[...], preferred_element_type=jnp.float32)
    h = jnp.maximum(h + b1_ref[...], 0.0)
    # fc2
    h = jnp.dot(h, w2_ref[...], preferred_element_type=jnp.float32) + b2_ref[...]
    h = jnp.maximum(h, 0.0)
    # fc3 (output lanes zero-padded to 128 so the store is unmasked)
    y = jnp.dot(h, w3_ref[...], preferred_element_type=jnp.float32) + b3_ref[...]
    o_ref[...] = y.astype(o_ref.dtype)


# ------------------------ one-time param conversion ------------------------ #

def prepare_params(params, obs_dim):
    """Convert PyTorch-layout params to (K, N) matmul layout once, up front."""
    fc1_w = jnp.asarray(params["fc1_w"], jnp.float32)   # (256, obs+act)
    fc3_w = jnp.asarray(params["fc3_w"], jnp.float32)   # (1, 256)
    w3 = jnp.zeros((H2, OUT_PAD), jnp.float32).at[:, 0].set(fc3_w[0])
    b3 = jnp.zeros((1, OUT_PAD), jnp.float32).at[0, 0].set(
        jnp.asarray(params["fc3_b"], jnp.float32)[0])
    return {
        "w1x": fc1_w[:, :obs_dim].T,                                  # (obs, 256)
        "w1a": fc1_w[:, obs_dim:].T,                                  # (act, 256)
        "b1": jnp.asarray(params["fc1_b"], jnp.float32).reshape(1, H1),
        "w2": jnp.asarray(params["fc2_w"], jnp.float32).T,            # (256, 256)
        "b2": jnp.asarray(params["fc2_b"], jnp.float32).reshape(1, H2),
        "w3": w3,                                                     # (256, 128)
        "b3": b3,                                                     # (1, 128)
    }


# ------------------------------- forward ----------------------------------- #

def vector_q_forward(x, a, p):
    """Pallas implementation of VectorQNetwork.forward; returns (B, 1)."""
    x = x.astype(jnp.float32)
    a = a.astype(jnp.float32)
    B, obs_dim = x.shape
    act_dim = a.shape[1]

    # Row tiling: one tile for small batches, 256-row tiles (parallel grid
    # axis -> megacore sharding) for large batches.
    if B <= MAX_ROW_TILE:
        tb = _round_up(B, 8)
        b_pad = tb
    else:
        tb = MAX_ROW_TILE
        b_pad = _round_up(B, tb)
    if b_pad != B:
        x = jnp.pad(x, ((0, b_pad - B), (0, 0)))
        a = jnp.pad(a, ((0, b_pad - B), (0, 0)))
    grid = (b_pad // tb,)

    flops = 2 * b_pad * ((obs_dim + act_dim) * H1 + H1 * H2 + H2 * OUT_PAD)
    bytes_accessed = 4 * (b_pad * (obs_dim + act_dim + OUT_PAD)
                          + (obs_dim + act_dim) * H1 + H1 * H2
                          + H2 * OUT_PAD + H1 + H2 + OUT_PAD)

    out = pl.pallas_call(
        _vector_q_kernel,
        out_shape=jax.ShapeDtypeStruct((b_pad, OUT_PAD), jnp.float32),
        grid=grid,
        in_specs=[
            pl.BlockSpec((tb, obs_dim), lambda i: (i, 0)),   # x row tile
            pl.BlockSpec((tb, act_dim), lambda i: (i, 0)),   # a row tile
            pl.BlockSpec((obs_dim, H1), lambda i: (0, 0)),   # W1[:, :obs].T
            pl.BlockSpec((act_dim, H1), lambda i: (0, 0)),   # W1[:, obs:].T
            pl.BlockSpec((1, H1), lambda i: (0, 0)),         # b1
            pl.BlockSpec((H1, H2), lambda i: (0, 0)),        # W2.T
            pl.BlockSpec((1, H2), lambda i: (0, 0)),         # b2
            pl.BlockSpec((H2, OUT_PAD), lambda i: (0, 0)),   # W3.T (lane-padded)
            pl.BlockSpec((1, OUT_PAD), lambda i: (0, 0)),    # b3   (lane-padded)
        ],
        out_specs=pl.BlockSpec((tb, OUT_PAD), lambda i: (i, 0)),
        compiler_params=pltpu.CompilerParams(
            dimension_semantics=("parallel",)),
        cost_estimate=pl.CostEstimate(
            flops=flops, transcendentals=0, bytes_accessed=bytes_accessed),
    )(x, a, p["w1x"], p["w1a"], p["b1"], p["w2"], p["b2"], p["w3"], p["b3"])

    return out[:B, :1]


# ------------------------- Pure-JAX reference ------------------------------ #

def reference_forward(x, a, params):
    xa = jnp.concatenate([x, a], axis=1)
    h = jax.nn.relu(xa @ params["fc1_w"].T + params["fc1_b"])
    h = jax.nn.relu(h @ params["fc2_w"].T + params["fc2_b"])
    return h @ params["fc3_w"].T + params["fc3_b"]


# --------------------------------- main ------------------------------------ #

def init_params(key, obs_dim, act_dim):
    ks = jax.random.split(key, 6)
    s = 0.05
    in_dim = obs_dim + act_dim
    return {
        "fc1_w": jax.random.normal(ks[0], (H1, in_dim), jnp.float32) * s,
        "fc1_b": jax.random.normal(ks[1], (H1,), jnp.float32) * s,
        "fc2_w": jax.random.normal(ks[2], (H2, H1), jnp.float32) * s,
        "fc2_b": jax.random.normal(ks[3], (H2,), jnp.float32) * s,
        "fc3_w": jax.random.normal(ks[4], (1, H2), jnp.float32) * s,
        "fc3_b": jax.random.normal(ks[5], (1,), jnp.float32) * s,
    }


if __name__ == "__main__":
    # Vector observation + continuous action (e.g. obs dim 17, action dim 6).
    batch, obs_dim, act_dim = 4, 17, 6

    key = jax.random.PRNGKey(0)
    k_x, k_a, k_p = jax.random.split(key, 3)
    x = jax.random.normal(k_x, (batch, obs_dim), jnp.float32)
    a = jax.random.normal(k_a, (batch, act_dim), jnp.float32)
    params = init_params(k_p, obs_dim, act_dim)

    prepped = prepare_params(params, obs_dim)          # one-time layout work
    fwd = jax.jit(vector_q_forward)

    out = jax.block_until_ready(fwd(x, a, prepped))
    ref = jax.block_until_ready(reference_forward(x, a, params))

    assert out.shape == (batch, 1), out.shape
    np.testing.assert_allclose(np.asarray(out), np.asarray(ref),
                               rtol=1e-4, atol=1e-5)
    print("KERNEL_OK")
</pallas_src>

<mosaic_0001>
module attributes {stable_mosaic.version = 11 : i64} {
  func.func @_vector_q_kernel(%arg0: i32, %arg1: memref<8x17xf32, #tpu.memory_space<vmem>>, %arg2: memref<8x6xf32, #tpu.memory_space<vmem>>, %arg3: memref<17x256xf32, #tpu.memory_space<vmem>>, %arg4: memref<6x256xf32, #tpu.memory_space<vmem>>, %arg5: memref<1x256xf32, #tpu.memory_space<vmem>>, %arg6: memref<256x256xf32, #tpu.memory_space<vmem>>, %arg7: memref<1x256xf32, #tpu.memory_space<vmem>>, %arg8: memref<256x128xf32, #tpu.memory_space<vmem>>, %arg9: memref<1x128xf32, #tpu.memory_space<vmem>>, %arg10: memref<8x128xf32, #tpu.memory_space<vmem>>) attributes {dimension_semantics = [#tpu.dimension_semantics<parallel>], iteration_bounds = array<i64: 1>, scalar_prefetch = 0 : i64, scratch_operands = 0 : i64, tpu.core_type = #tpu.core_type<tc>, window_params = [{transform_indices = @transform_0, window_bounds = array<i64: 8, 17>}, {transform_indices = @transform_1, window_bounds = array<i64: 8, 6>}, {pipeline_mode = #tpu.pipeline_mode<synchronous>, transform_indices = @transform_2, window_bounds = array<i64: 17, 256>}, {pipeline_mode = #tpu.pipeline_mode<synchronous>, transform_indices = @transform_3, window_bounds = array<i64: 6, 256>}, {pipeline_mode = #tpu.pipeline_mode<synchronous>, transform_indices = @transform_4, window_bounds = array<i64: 1, 256>}, {pipeline_mode = #tpu.pipeline_mode<synchronous>, transform_indices = @transform_5, window_bounds = array<i64: 256, 256>}, {pipeline_mode = #tpu.pipeline_mode<synchronous>, transform_indices = @transform_6, window_bounds = array<i64: 1, 256>}, {pipeline_mode = #tpu.pipeline_mode<synchronous>, transform_indices = @transform_7, window_bounds = array<i64: 256, 128>}, {pipeline_mode = #tpu.pipeline_mode<synchronous>, transform_indices = @transform_8, window_bounds = array<i64: 1, 128>}, {transform_indices = @transform_9, window_bounds = array<i64: 8, 128>}]} {
    %c0 = arith.constant 0 : index
    %c0_0 = arith.constant 0 : index
    %0 = vector.load %arg1[%c0, %c0_0] : memref<8x17xf32, #tpu.memory_space<vmem>>, vector<8x17xf32>
    %c0_1 = arith.constant 0 : index
    %c0_2 = arith.constant 0 : index
    %1 = vector.load %arg3[%c0_1, %c0_2] : memref<17x256xf32, #tpu.memory_space<vmem>>, vector<17x256xf32>
    %cst = arith.constant dense<0.000000e+00> : vector<8x256xf32>
    %2 = tpu.matmul %0, %1, %cst {dimension_numbers = #tpu.dot_dimension_numbers<[1], [0], [0], [1], [0, 0, 1, 1], [], []>} : vector<8x17xf32>, vector<17x256xf32>, vector<8x256xf32> -> vector<8x256xf32>
    %c0_3 = arith.constant 0 : index
    %c0_4 = arith.constant 0 : index
    %3 = vector.load %arg2[%c0_3, %c0_4] : memref<8x6xf32, #tpu.memory_space<vmem>>, vector<8x6xf32>
    %c0_5 = arith.constant 0 : index
    %c0_6 = arith.constant 0 : index
    %4 = vector.load %arg4[%c0_5, %c0_6] : memref<6x256xf32, #tpu.memory_space<vmem>>, vector<6x256xf32>
    %cst_7 = arith.constant dense<0.000000e+00> : vector<8x256xf32>
    %5 = tpu.matmul %3, %4, %cst_7 {dimension_numbers = #tpu.dot_dimension_numbers<[1], [0], [0], [1], [0, 0, 1, 1], [], []>} : vector<8x6xf32>, vector<6x256xf32>, vector<8x256xf32> -> vector<8x256xf32>
    %6 = arith.addf %2, %5 : vector<8x256xf32>
    %c0_8 = arith.constant 0 : index
    %c0_9 = arith.constant 0 : index
    %7 = vector.load %arg5[%c0_8, %c0_9] : memref<1x256xf32, #tpu.memory_space<vmem>>, vector<1x256xf32>
    %8 = vector.broadcast %7 : vector<1x256xf32> to vector<8x256xf32>
    %9 = arith.addf %6, %8 : vector<8x256xf32>
    %cst_10 = arith.constant 0.000000e+00 : f32
    %10 = vector.broadcast %cst_10 : f32 to vector<8x256xf32>
    %11 = arith.maximumf %9, %10 : vector<8x256xf32>
    %c0_11 = arith.constant 0 : index
    %c0_12 = arith.constant 0 : index
    %12 = vector.load %arg6[%c0_11, %c0_12] : memref<256x256xf32, #tpu.memory_space<vmem>>, vector<256x256xf32>
    %cst_13 = arith.constant dense<0.000000e+00> : vector<8x256xf32>
    %13 = tpu.matmul %11, %12, %cst_13 {dimension_numbers = #tpu.dot_dimension_numbers<[1], [0], [0], [1], [0, 0, 1, 1], [], []>} : vector<8x256xf32>, vector<256x256xf32>, vector<8x256xf32> -> vector<8x256xf32>
    %c0_14 = arith.constant 0 : index
    %c0_15 = arith.constant 0 : index
    %14 = vector.load %arg7[%c0_14, %c0_15] : memref<1x256xf32, #tpu.memory_space<vmem>>, vector<1x256xf32>
    %15 = vector.broadcast %14 : vector<1x256xf32> to vector<8x256xf32>
    %16 = arith.addf %13, %15 : vector<8x256xf32>
    %cst_16 = arith.constant 0.000000e+00 : f32
    %17 = vector.broadcast %cst_16 : f32 to vector<8x256xf32>
    %18 = arith.maximumf %16, %17 : vector<8x256xf32>
    %c0_17 = arith.constant 0 : index
    %c0_18 = arith.constant 0 : index
    %19 = vector.load %arg8[%c0_17, %c0_18] : memref<256x128xf32, #tpu.memory_space<vmem>>, vector<256x128xf32>
    %cst_19 = arith.constant dense<0.000000e+00> : vector<8x128xf32>
    %20 = tpu.matmul %18, %19, %cst_19 {dimension_numbers = #tpu.dot_dimension_numbers<[1], [0], [0], [1], [0, 0, 1, 1], [], []>} : vector<8x256xf32>, vector<256x128xf32>, vector<8x128xf32> -> vector<8x128xf32>
    %c0_20 = arith.constant 0 : index
    %c0_21 = arith.constant 0 : index
    %21 = vector.load %arg9[%c0_20, %c0_21] : memref<1x128xf32, #tpu.memory_space<vmem>>, vector<1x128xf32>
    %22 = vector.broadcast %21 : vector<1x128xf32> to vector<8x128xf32>
    %23 = arith.addf %20, %22 : vector<8x128xf32>
    %c0_22 = arith.constant 0 : index
    %c0_23 = arith.constant 0 : index
    %24 = vector.load %arg10[%c0_22, %c0_23] : memref<8x128xf32, #tpu.memory_space<vmem>>, vector<8x128xf32>
    tpu.vector_store %arg10[%c0_22, %c0_23], %23 {strides = array<i32>} : memref<8x128xf32, #tpu.memory_space<vmem>>, vector<8x128xf32>,
    return
  }
  func.func @transform_0(%arg0: i32) -> (i32, i32) {
    %c0_i32 = arith.constant 0 : i32
    %c0_i32_0 = arith.constant 0 : i32
    return %arg0, %c0_i32 : i32, i32
  }
  func.func @transform_1(%arg0: i32) -> (i32, i32) {
    %c0_i32 = arith.constant 0 : i32
    %c0_i32_0 = arith.constant 0 : i32
    return %arg0, %c0_i32 : i32, i32
  }
  func.func @transform_2(%arg0: i32) -> (i32, i32) {
    %c0_i32 = arith.constant 0 : i32
    %c0_i32_0 = arith.constant 0 : i32
    %c0_i32_1 = arith.constant 0 : i32
    return %c0_i32, %c0_i32_0 : i32, i32
  }
  func.func @transform_3(%arg0: i32) -> (i32, i32) {
    %c0_i32 = arith.constant 0 : i32
    %c0_i32_0 = arith.constant 0 : i32
    %c0_i32_1 = arith.constant 0 : i32
    return %c0_i32, %c0_i32_0 : i32, i32
  }
  func.func @transform_4(%arg0: i32) -> (i32, i32) {
    %c0_i32 = arith.constant 0 : i32
    %c0_i32_0 = arith.constant 0 : i32
    %c0_i32_1 = arith.constant 0 : i32
    return %c0_i32, %c0_i32_0 : i32, i32
  }
  func.func @transform_5(%arg0: i32) -> (i32, i32) {
    %c0_i32 = arith.constant 0 : i32
    %c0_i32_0 = arith.constant 0 : i32
    %c0_i32_1 = arith.constant 0 : i32
    return %c0_i32, %c0_i32_0 : i32, i32
  }
  func.func @transform_6(%arg0: i32) -> (i32, i32) {
    %c0_i32 = arith.constant 0 : i32
    %c0_i32_0 = arith.constant 0 : i32
    %c0_i32_1 = arith.constant 0 : i32
    return %c0_i32, %c0_i32_0 : i32, i32
  }
  func.func @transform_7(%arg0: i32) -> (i32, i32) {
    %c0_i32 = arith.constant 0 : i32
    %c0_i32_0 = arith.constant 0 : i32
    %c0_i32_1 = arith.constant 0 : i32
    return %c0_i32, %c0_i32_0 : i32, i32
  }
  func.func @transform_8(%arg0: i32) -> (i32, i32) {
    %c0_i32 = arith.constant 0 : i32
    %c0_i32_0 = arith.constant 0 : i32
    %c0_i32_1 = arith.constant 0 : i32
    return %c0_i32, %c0_i32_0 : i32, i32
  }
  func.func @transform_9(%arg0: i32) -> (i32, i32) {
    %c0_i32 = arith.constant 0 : i32
    %c0_i32_0 = arith.constant 0 : i32
    return %arg0, %c0_i32 : i32, i32
  }
}

</mosaic_0001>

<bundles_post_ra>
// kernel: vector_q_forward.1
= control target key start
LH: loop header
LB: loop body
LE: loop exit
PB: predicated region body
PF: predicated region fallthrough
CT: control target
= control target key end

     0   :  { %14 = vsyncpa [#allocation3], 0  ;;  %s618_s0 = inlined_call_operand.vmem [shape: f32[8,17], index: 0, kind: input, shape index: {}]   ;;  %s619_s1 = inlined_call_operand.vmem [shape: f32[8,6], index: 1, kind: input, shape index: {}]   ;;  %s620_s2 = inlined_call_operand.hbm [shape: f32[17,256], index: 2, kind: input, shape index: {}]   ;;  %s621_s3 = inlined_call_operand.vmem [shape: f32[6,256], index: 3, kind: input, shape index: {}]   ;;  %s622_s4 = inlined_call_operand.vmem [shape: f32[1,256], index: 4, kind: input, shape index: {}]   ;;  %s623_s5 = inlined_call_operand.hbm [shape: f32[256,256], index: 5, kind: input, shape index: {}]   ;;  %s624_s6 = inlined_call_operand.vmem [shape: f32[1,256], index: 6, kind: input, shape index: {}]   ;;  %s625_s7 = inlined_call_operand.hbm [shape: f32[256,128], index: 7, kind: input, shape index: {}]   ;;  %s626_s8 = inlined_call_operand.vmem [shape: f32[1,128], index: 8, kind: input, shape index: {}]   ;;  %s627_s9 = inlined_call_operand.vmem [shape: f32[8,128], index: 9, kind: output, shape index: {}]  }
   0x1   :  { %15 = vsyncpa [#allocation5], 0  ;;  %s41_s11 = sshll.u32 %s623_s5, 4  ;;  %s528_s12 = smov [#allocation4]   ;;  %s42_s11 = int_to_ptr.hbm [resolvable:$true] %s41_s11 }
   0x2   :  { %s43_s13 = sshll.u32 %s528_s12, 4  ;;  %s24_s16 = sshll.u32 %s620_s2, 4  ;;  %s44_s13 = int_to_ptr.vmem [resolvable:$true] %s43_s13  ;;  %s25_s16 = int_to_ptr.hbm [resolvable:$true] %s24_s16 }
   0x3   :  { %s529_s17 = smov 256   ;;  %s530_s18 = smov 16  }
   0x4   :  { %49 = dma.hbm_to_vmem [thread:$0]  %s42_s11, 8192, %s44_s13, [#allocation5], %s529_s17, %s529_s17, %s530_s18  }
   0x5   :  { %s531_s19 = smov [#allocation2]   ;;  %s56_s23 = sshll.u32 %s625_s7, 4  ;;  %s57_s23 = int_to_ptr.hbm [resolvable:$true] %s56_s23 }
   0x6   :  { %s26_s20 = sshll.u32 %s531_s19, 4  ;;  %s532_s5 = smov [#allocation6]   ;;  %s27_s20 = int_to_ptr.vmem [resolvable:$true] %s26_s20 }
   0x7   :  { %32 = dma.hbm_to_vmem [thread:$0]  %s25_s16, 768, %s27_s20, [#allocation3], %s529_s17, %s529_s17, %s530_s18  }
   0x8   :  { %s58_s24 = sshll.u32 %s532_s5, 4  ;;  %s533_s25 = smov 128   ;;  %s59_s24 = int_to_ptr.vmem [resolvable:$true] %s58_s24 }
   0x9   :  { %s534_s26 = smov 8  }
   0xa   :  { %64 = dma.hbm_to_vmem [thread:$0]  %s57_s23, 4096, %s59_s24, [#allocation5], %s533_s25, %s533_s25, %s534_s26  }
   0xb   :  { %524 = dma.done.wait [#allocation3], 768  }
   0xc   :  { %525 = vsyncadd [#allocation3], 4294966528 }
   0xd   :  { %526 = dma.done.wait [#allocation5], 12288  }
   0xe   :  { %527 = vsyncadd [#allocation5], 4294955008  ;;  %vm93_vm0 = vcmask 1045504   ;;  %vm89_vm1 = vcmask 48128   ;;  %v87_v0 = vld [vmem:[%s621_s3] sm:$0x3f] }
   0xf   :  { %v88_v1 = vld [vmem:[%s621_s3 + $0x8] sm:$0x3f]  ;;  %v86_v2 = vld [vmem:[%s619_s1] sm:$0xff]  ;;  %vm144_vm2 = vcmask 1040384   ;;  %436 = vmatpush.msk.msra.mxu2 %vm93_vm0, %v87_v0  ;;  %v82_v5 = vld [vmem:[#allocation2 + $0x10] sm:$0xff]  ;;  %vm140_vm3 = vcmask 138240  }
  0x10   :  { %438 = vmatpush.msk.msra.mxu3 %vm93_vm0, %v88_v1  ;;  %v84_v3 = vld [vmem:[#allocation2 + $0x20] sm:$0x1]  ;;  %v85_v4 = vld [vmem:[#allocation2 + $0x28] sm:$0x1]  ;;  %437 = vmatmul.msk.f32.vlgmr.msra.gmra.mxu2 %vm89_vm1, %v86_v2  ;;  %v83_v6 = vld [vmem:[#allocation2 + $0x18] sm:$0xff] }
  0x11   :  { %439 = vmatmul.msk.f32.vlgmr.msra.gmra.mxu3 %vm89_vm1, %v86_v2  ;;  %440 = vmatpush.msk.msrb.mxu2 %vm144_vm2, %v84_v3  ;;  %v231_v7 = vld [vmem:[#allocation4 + $0xf0] sm:$0xff]  ;;  %v81_v10 = vld [vmem:[#allocation2 + $0x8] sm:$0xff]  ;;  %v229_v11 = vld [vmem:[#allocation4 + $0xe0] sm:$0xff] }
  0x12   :  { %442 = vmatpush.msk.msrb.mxu3 %vm144_vm2, %v85_v4  ;;  %v263_v8 = vld [vmem:[#allocation4 + $0x1f0] sm:$0xff]  ;;  %271 = vmatpush.msra.mxu0 %v231_v7  ;;  %v232_v12 = vld [vmem:[#allocation4 + $0xf8] sm:$0xff]  ;;  %v261_v14 = vld [vmem:[#allocation4 + $0x1e0] sm:$0xff] }
  0x13   :  { %v80_v9 = vld [vmem:[#allocation2] sm:$0xff]  ;;  %291 = vmatpush.msra.mxu1 %v263_v8  ;;  %165 = vmatpush.msrb.mxu2 %v82_v5  ;;  %v264_v13 = vld [vmem:[#allocation4 + $0x1f8] sm:$0xff]  ;;  %v230_v18 = vld [vmem:[#allocation4 + $0xe8] sm:$0xff] }
  0x14   :  { %185 = vmatpush.msrb.mxu3 %v83_v6  ;;  %272 = vmatpush.msra.mxu0 %v229_v11  ;;  %v227_v15 = vld [vmem:[#allocation4 + $0xd0] sm:$0xff]  ;;  %v262_v19 = vld [vmem:[#allocation4 + $0x1e8] sm:$0xff]  ;;  %v225_v20 = vld [vmem:[#allocation4 + $0xc0] sm:$0xff] }
  0x15   :  { %292 = vmatpush.msra.mxu1 %v261_v14  ;;  %v259_v16 = vld [vmem:[#allocation4 + $0x1d0] sm:$0xff]  ;;  %166 = vmatpush.msrb.mxu2 %v80_v9  ;;  %v257_v21 = vld [vmem:[#allocation4 + $0x1c0] sm:$0xff]  ;;  %v228_v22 = vld [vmem:[#allocation4 + $0xd8] sm:$0xff] }
  0x16   :  { %186 = vmatpush.msrb.mxu3 %v81_v10  ;;  %v79_v17 = vld [vmem:[%s618_s0] sm:$0xff]  ;;  %273 = vmatpush.msra.mxu0 %v227_v15  ;;  %v260_v23 = vld [vmem:[#allocation4 + $0x1d8] sm:$0xff]  ;;  %v226_v26 = vld [vmem:[#allocation4 + $0xc8] sm:$0xff] }
  0x17   :  { %311 = vmatpush.msra.mxu2 %v232_v12  ;;  %293 = vmatpush.msra.mxu1 %v259_v16  ;;  %v223_v24 = vld [vmem:[#allocation4 + $0xb0] sm:$0xff]  ;;  %v258_v27 = vld [vmem:[#allocation4 + $0x1c8] sm:$0xff]  ;;  %v221_v28 = vld [vmem:[#allocation4 + $0xa0] sm:$0xff] }
  0x18   :  { %331 = vmatpush.msra.mxu3 %v264_v13  ;;  %441 = vmatmul.msk.f32.vlgmr.msrb.gmra.mxu2 %vm140_vm3, %v79_v17  ;;  %v255_v25 = vld [vmem:[#allocation4 + $0x1b0] sm:$0xff]  ;;  %v253_v29 = vld [vmem:[#allocation4 + $0x1a0] sm:$0xff]  ;;  %v224_v30 = vld [vmem:[#allocation4 + $0xb8] sm:$0xff] }
  0x19   :  { %443 = vmatmul.msk.f32.vlgmr.msrb.gmra.mxu3 %vm140_vm3, %v79_v17  ;;  %312 = vmatpush.msra.mxu2 %v230_v18  ;;  %v256_v31 = vld [vmem:[#allocation4 + $0x1b8] sm:$0xff]  ;;  %v219_v32 = vld [vmem:[#allocation4 + $0x90] sm:$0xff]  ;;  %v222_v34 = vld [vmem:[#allocation4 + $0xa8] sm:$0xff] }
  0x1a   :  { %332 = vmatpush.msra.mxu3 %v262_v19  ;;  %274 = vmatpush.msra.mxu0 %v225_v20  ;;  %v251_v33 = vld [vmem:[#allocation4 + $0x190] sm:$0xff]  ;;  %v254_v35 = vld [vmem:[#allocation4 + $0x1a8] sm:$0xff]  ;;  %v217_v36 = vld [vmem:[#allocation4 + $0x80] sm:$0xff] }
  0x1b   :  { %294 = vmatpush.msra.mxu1 %v257_v21  ;;  %313 = vmatpush.msra.mxu2 %v228_v22  ;;  %v249_v37 = vld [vmem:[#allocation4 + $0x180] sm:$0xff]  ;;  %v220_v38 = vld [vmem:[#allocation4 + $0x98] sm:$0xff]  ;;  %v218_v40 = vld [vmem:[#allocation4 + $0x88] sm:$0xff] }
  0x1c   :  { %333 = vmatpush.msra.mxu3 %v260_v23  ;;  %275 = vmatpush.msra.mxu0 %v223_v24  ;;  %v252_v39 = vld [vmem:[#allocation4 + $0x198] sm:$0xff]  ;;  %v250_v41 = vld [vmem:[#allocation4 + $0x188] sm:$0xff]  ;;  %v215_v42 = vld [vmem:[#allocation4 + $0x70] sm:$0xff] }
  0x1d   :  { %295 = vmatpush.msra.mxu1 %v255_v25  ;;  %314 = vmatpush.msra.mxu2 %v226_v26  ;;  %v247_v43 = vld [vmem:[#allocation4 + $0x170] sm:$0xff]  ;;  %v216_v44 = vld [vmem:[#allocation4 + $0x78] sm:$0xff]  ;;  %v213_v46 = vld [vmem:[#allocation4 + $0x60] sm:$0xff] }
  0x1e   :  { %334 = vmatpush.msra.mxu3 %v258_v27  ;;  %276 = vmatpush.msra.mxu0 %v221_v28  ;;  %v248_v45 = vld [vmem:[#allocation4 + $0x178] sm:$0xff]  ;;  %v245_v47 = vld [vmem:[#allocation4 + $0x160] sm:$0xff]  ;;  %v214_v48 = vld [vmem:[#allocation4 + $0x68] sm:$0xff] }
  0x1f   :  { %296 = vmatpush.msra.mxu1 %v253_v29  ;;  %315 = vmatpush.msra.mxu2 %v224_v30  ;;  %v246_v49 = vld [vmem:[#allocation4 + $0x168] sm:$0xff]  ;;  %v211_v50 = vld [vmem:[#allocation4 + $0x50] sm:$0xff]  ;;  %v212_v52 = vld [vmem:[#allocation4 + $0x58] sm:$0xff] }
  0x20   :  { %335 = vmatpush.msra.mxu3 %v256_v31  ;;  %277 = vmatpush.msra.mxu0 %v219_v32  ;;  %v243_v51 = vld [vmem:[#allocation4 + $0x150] sm:$0xff]  ;;  %v244_v53 = vld [vmem:[#allocation4 + $0x158] sm:$0xff]  ;;  %v209_v54 = vld [vmem:[#allocation4 + $0x40] sm:$0xff] }
  0x21   :  { %297 = vmatpush.msra.mxu1 %v251_v33  ;;  %316 = vmatpush.msra.mxu2 %v222_v34  ;;  %v241_v55 = vld [vmem:[#allocation4 + $0x140] sm:$0xff]  ;;  %v210_v56 = vld [vmem:[#allocation4 + $0x48] sm:$0xff]  ;;  %v207_v58 = vld [vmem:[#allocation4 + $0x30] sm:$0xff] }
  0x22   :  { %336 = vmatpush.msra.mxu3 %v254_v35  ;;  %278 = vmatpush.msra.mxu0 %v217_v36  ;;  %v242_v57 = vld [vmem:[#allocation4 + $0x148] sm:$0xff]  ;;  %v239_v59 = vld [vmem:[#allocation4 + $0x130] sm:$0xff]  ;;  %v208_v60 = vld [vmem:[#allocation4 + $0x38] sm:$0xff] }
  0x23   :  { %298 = vmatpush.msra.mxu1 %v249_v37  ;;  %317 = vmatpush.msra.mxu2 %v220_v38  ;;  %v240_v61 = vld [vmem:[#allocation4 + $0x138] sm:$0xff]  ;;  %v205_v62 = vld [vmem:[#allocation4 + $0x20] sm:$0xff]  ;;  %v206_v0 = vld [vmem:[#allocation4 + $0x28] sm:$0xff] }
  0x24   :  { %337 = vmatpush.msra.mxu3 %v252_v39  ;;  %279 = vmatpush.msra.mxu0 %v215_v42  ;;  %v237_v63 = vld [vmem:[#allocation4 + $0x120] sm:$0xff]  ;;  %v238_v1 = vld [vmem:[#allocation4 + $0x128] sm:$0xff]  ;;  %v203_v2 = vld [vmem:[#allocation4 + $0x10] sm:$0xff] }
  0x25   :  { %318 = vmatpush.msra.mxu2 %v218_v40  ;;  %299 = vmatpush.msra.mxu1 %v247_v43  ;;  %v235_v3 = vld [vmem:[#allocation4 + $0x110] sm:$0xff]  ;;  %v204_v4 = vld [vmem:[#allocation4 + $0x18] sm:$0xff]  ;;  %v201_v6 = vld [vmem:[#allocation4] sm:$0xff] }
  0x26   :  { %338 = vmatpush.msra.mxu3 %v250_v41  ;;  %280 = vmatpush.msra.mxu0 %v213_v46  ;;  %v236_v5 = vld [vmem:[#allocation4 + $0x118] sm:$0xff]  ;;  %v233_v7 = vld [vmem:[#allocation4 + $0x100] sm:$0xff]  ;;  %v202_v8 = vld [vmem:[#allocation4 + $0x8] sm:$0xff] }
  0x27   :  { %319 = vmatpush.msra.mxu2 %v216_v44  ;;  %300 = vmatpush.msra.mxu1 %v245_v47  ;;  %v234_v9 = vld [vmem:[#allocation4 + $0x108] sm:$0xff]  ;;  %v368_v10 = vld [vmem:[#allocation6 + $0x78] sm:$0xff]  ;;  %v367_v11 = vld [vmem:[#allocation6 + $0x70] sm:$0xff] }
  0x28   :  { %339 = vmatpush.msra.mxu3 %v248_v45  ;;  %281 = vmatpush.msra.mxu0 %v211_v50  ;;  %v384_v12 = vld [vmem:[#allocation6 + $0xf8] sm:$0xff]  ;;  %v366_v13 = vld [vmem:[#allocation6 + $0x68] sm:$0xff]  ;;  %v383_v14 = vld [vmem:[#allocation6 + $0xf0] sm:$0xff] }
  0x29   :  { %320 = vmatpush.msra.mxu2 %v214_v48  ;;  %301 = vmatpush.msra.mxu1 %v243_v51  ;;  %v382_v15 = vld [vmem:[#allocation6 + $0xe8] sm:$0xff]  ;;  %v365_v16 = vld [vmem:[#allocation6 + $0x60] sm:$0xff]  ;;  %v364_v18 = vld [vmem:[#allocation6 + $0x58] sm:$0xff] }
  0x2a   :  { %340 = vmatpush.msra.mxu3 %v246_v49  ;;  %282 = vmatpush.msra.mxu0 %v209_v54  ;;  %v381_v17 = vld [vmem:[#allocation6 + $0xe0] sm:$0xff]  ;;  %v380_v19 = vld [vmem:[#allocation6 + $0xd8] sm:$0xff]  ;;  %v363_v20 = vld [vmem:[#allocation6 + $0x50] sm:$0xff] }
  0x2b   :  { %321 = vmatpush.msra.mxu2 %v212_v52  ;;  %302 = vmatpush.msra.mxu1 %v241_v55  ;;  %v379_v21 = vld [vmem:[#allocation6 + $0xd0] sm:$0xff]  ;;  %v362_v22 = vld [vmem:[#allocation6 + $0x48] sm:$0xff]  ;;  %v361_v24 = vld [vmem:[#allocation6 + $0x40] sm:$0xff] }
  0x2c   :  { %341 = vmatpush.msra.mxu3 %v244_v53  ;;  %283 = vmatpush.msra.mxu0 %v207_v58  ;;  %v378_v23 = vld [vmem:[#allocation6 + $0xc8] sm:$0xff]  ;;  %v377_v25 = vld [vmem:[#allocation6 + $0xc0] sm:$0xff]  ;;  %v360_v26 = vld [vmem:[#allocation6 + $0x38] sm:$0xff] }
  0x2d   :  { %322 = vmatpush.msra.mxu2 %v210_v56  ;;  %303 = vmatpush.msra.mxu1 %v239_v59  ;;  %v376_v27 = vld [vmem:[#allocation6 + $0xb8] sm:$0xff]  ;;  %v359_v30 = vld [vmem:[#allocation6 + $0x30] sm:$0xff]  ;;  %v358_v31 = vld [vmem:[#allocation6 + $0x28] sm:$0xff] }
  0x2e   :  { %342 = vmatpush.msra.mxu3 %v242_v57  ;;  %284 = vmatpush.msra.mxu0 %v205_v62  ;;  %v191_v32 = vld [vmem:[%s622_s4] sm:$0x3]  ;;  %v357_v33 = vld [vmem:[#allocation6 + $0x20] sm:$0xff]  ;;  %v356_v44 = vld [vmem:[#allocation6 + $0x18] sm:$0xff] }
  0x2f   :  { %323 = vmatpush.msra.mxu2 %v208_v60  ;;  %304 = vmatpush.msra.mxu1 %v237_v63  ;;  %v193_v34 = vperm.slane %v191_v32, 0  ;;  %v194_v35 = vperm.slane %v191_v32, 1  ;;  %v375_v45 = vld [vmem:[#allocation6 + $0xb0] sm:$0xff]  ;;  %v374_v47 = vld [vmem:[#allocation6 + $0xa8] sm:$0xff]  ;;  %v373_v49 = vld [vmem:[#allocation6 + $0xa0] sm:$0xff] }
  0x30   :  { %343 = vmatpush.msra.mxu3 %v240_v61  ;;  %285 = vmatpush.msra.mxu0 %v203_v2  ;;  %v355_v46 = vld [vmem:[#allocation6 + $0x10] sm:$0xff]  ;;  %v354_v48 = vld [vmem:[#allocation6 + $0x8] sm:$0xff]  ;;  %v353_v50 = vld [vmem:[#allocation6] sm:$0xff] }
  0x31   :  { %324 = vmatpush.msra.mxu2 %v206_v0  ;;  %305 = vmatpush.msra.mxu1 %v235_v3  ;;  %v372_v51 = vld [vmem:[#allocation6 + $0x98] sm:$0xff]  ;;  %v371_v52 = vld [vmem:[#allocation6 + $0x90] sm:$0xff]  ;;  %v370_v53 = vld [vmem:[#allocation6 + $0x88] sm:$0xff] }
  0x32   :  { %344 = vmatpush.msra.mxu3 %v238_v1  ;;  %286 = vmatpush.msra.mxu0 %v201_v6  ;;  %v369_v54 = vld [vmem:[#allocation6 + $0x80] sm:$0xff]  ;;  %v265_v55 = vld [vmem:[%s624_s6] sm:$0x3] }
  0x33   :  { %325 = vmatpush.msra.mxu2 %v204_v4  ;;  %306 = vmatpush.msra.mxu1 %v233_v7  ;;  %v267_v56 = vperm.slane %v265_v55, 0  ;;  %v268_v61 = vperm.slane %v265_v55, 1  ;;  %v451_v4 = vld [vmem:[%s626_s8] ss:$0 sm:$0xff] }
  0x34   :  { %345 = vmatpush.msra.mxu3 %v236_v5  ;;  %389 = vmatpush.msrb.mxu0 %v368_v10 }
  0x35   :  { %326 = vmatpush.msra.mxu2 %v202_v8  ;;  %409 = vmatpush.msrb.mxu1 %v384_v12 }
  0x36   :  { %346 = vmatpush.msra.mxu3 %v234_v9  ;;  %390 = vmatpush.msrb.mxu0 %v367_v11 }
  0x37   :  { %410 = vmatpush.msrb.mxu1 %v383_v14 }
  0x38   :  { %391 = vmatpush.msrb.mxu0 %v366_v13 }
  0x39   :  { %411 = vmatpush.msrb.mxu1 %v382_v15 }
  0x3a   :  { %392 = vmatpush.msrb.mxu0 %v365_v16 }
  0x3b   :  { %412 = vmatpush.msrb.mxu1 %v381_v17 }
  0x3c   :  { %393 = vmatpush.msrb.mxu0 %v364_v18 }
  0x3d   :  { %413 = vmatpush.msrb.mxu1 %v380_v19 }
  0x3e   :  { %394 = vmatpush.msrb.mxu0 %v363_v20 }
  0x3f   :  { %414 = vmatpush.msrb.mxu1 %v379_v21 }
  0x40   :  { %395 = vmatpush.msrb.mxu0 %v362_v22 }
  0x41   :  { %415 = vmatpush.msrb.mxu1 %v378_v23 }
  0x42   :  { %396 = vmatpush.msrb.mxu0 %v361_v24 }
  0x43   :  { %416 = vmatpush.msrb.mxu1 %v377_v25 }
  0x44   :  { %397 = vmatpush.msrb.mxu0 %v360_v26 }
  0x45   :  { %417 = vmatpush.msrb.mxu1 %v376_v27 }
  0x46   :  { %398 = vmatpush.msrb.mxu0 %v359_v30 }
  0x47   :  { %418 = vmatpush.msrb.mxu1 %v375_v45 }
  0x48   :  { %399 = vmatpush.msrb.mxu0 %v358_v31 }
  0x49   :  { %419 = vmatpush.msrb.mxu1 %v374_v47 }
  0x4a   :  { %400 = vmatpush.msrb.mxu0 %v357_v33 }
  0x4b   :  { %420 = vmatpush.msrb.mxu1 %v373_v49 }
  0x4c   :  { %401 = vmatpush.msrb.mxu0 %v356_v44 }
  0x4d   :  { %421 = vmatpush.msrb.mxu1 %v372_v51 }
  0x4e   :  { %402 = vmatpush.msrb.mxu0 %v355_v46 }
  0x4f   :  { %422 = vmatpush.msrb.mxu1 %v371_v52 }
  0x50   :  { %403 = vmatpush.msrb.mxu0 %v354_v48 }
  0x51   :  { %423 = vmatpush.msrb.mxu1 %v370_v53 }
  0x52   :  { %404 = vmatpush.msrb.mxu0 %v353_v50 }
  0x53   :  { %424 = vmatpush.msrb.mxu1 %v369_v54 }
  0x93   :  { %v117_v28 = vpop.f32.mrf.mxu2 }
  0x94   :  { %v137_v29 = vpop.f32.mrf.mxu3 }
  0x9b   :  { %v168_v36 = vpop.f32.mrf.mxu2 }
  0x9c   :  { %v188_v37 = vpop.f32.mrf.mxu3  ;;  %v169_v38 = vadd.f32 %v168_v36, %v117_v28 }
  0x9d   :  { %v189_v39 = vadd.f32 %v188_v37, %v137_v29 }
  0x9e   :  { %v197_v40 = vadd.f32 %v193_v34, %v169_v38 }
  0x9f   :  { %v198_v41 = vadd.f32 %v194_v35, %v189_v39 }
  0xa0   :  { %v199_v42 = vmax.f32 %v197_v40, 0.0 }
  0xa1   :  { %v200_v43 = vmax.f32 %v198_v41, 0.0 }
  0xa2   :  { %287 = vmatmul.f32.vlgmr.msra.gmra.mxu0 %v199_v42  ;;  %327 = vmatmul.f32.vlgmr.msra.gmra.mxu2 %v199_v42 }
  0xa3   :  { %307 = vmatmul.f32.vlgmr.msra.gmra.mxu1 %v200_v43  ;;  %347 = vmatmul.f32.vlgmr.msra.gmra.mxu3 %v200_v43 }
 0x11f   :  { %v288_v57 = vpop.f32.mrf.mxu0 }
 0x120   :  { %v289_v58 = vadd.f32 %v288_v57, %v267_v56  ;;  %v308_v59 = vpop.f32.mrf.mxu1 }
 0x122   :  { %v309_v60 = vadd.f32 %v308_v59, %v289_v58 }
 0x124   :  { %v351_v62 = vmax.f32 %v309_v60, 0.0 }
 0x125   :  { %v328_v63 = vpop.f32.mrf.mxu2 }
 0x126   :  { %405 = vmatmul.f32.vlgmr.msrb.gmra.mxu0 %v351_v62  ;;  %v329_v0 = vadd.f32 %v328_v63, %v268_v61  ;;  %v348_v1 = vpop.f32.mrf.mxu3 }
 0x128   :  { %v349_v2 = vadd.f32 %v348_v1, %v329_v0 }
 0x12a   :  { %v352_v3 = vmax.f32 %v349_v2, 0.0 }
 0x12c   :  { %425 = vmatmul.f32.vlgmr.msrb.gmra.mxu1 %v352_v3 }
 0x1a3   :  { %v406_v5 = vpop.f32.mrf.mxu0 }
 0x1a4   :  { %v407_v6 = vadd.f32 %v451_v4, %v406_v5 }
 0x1a9   :  { %v426_v7 = vpop.f32.mrf.mxu1 }
 0x1aa   :  { %v427_v8 = vadd.f32 %v426_v7, %v407_v6 }
 0x1ac   :  { %429 = vst [vmem:[%s627_s9] sm:$0xff] %v427_v8 }
 0x1ad   :  { %434 = vsyncpa [#allocation3], 1 }
 0x1ae   :  { %435 = vsyncpa [#allocation5], 1 }

</bundles_post_ra>
